<compile_context>
chip_gen: v6e
topology: v6e:2x2x1
jax: 0.10.0
libtpu: 0.0.40
codegen_flags: <defaults>
</compile_context>

<pallas_src>
import functools

import jax
import jax.numpy as jnp
from jax.experimental import pallas as pl
from jax.experimental.pallas import tpu as pltpu

LANE = 128     # TPU lane width  (last dim)
SUBLANE = 8    # TPU sublane     (second-to-last dim)


def _round_up(x, m):
    return ((x + m - 1) // m) * m


# ----------------------------------------------------------------------------- kernel
def _build_fused_critic_kernel(n_layers, activation):
    """Fused MLP critic: obs@W1o + act@W1a + b1 -> act -> ... -> Wn + bn.

    refs = (obs_ref, act_ref, W1o, W1a, b1, W2, b2, ..., Wn, bn, o_ref)
    All activations stay on-chip; accumulation is always f32.
    """

    def act_fn(x):
        if activation == "relu":
            return jnp.maximum(x, 0.0)
        if activation == "tanh":
            return jnp.tanh(x)
        return x  # identity

    def kernel(*refs):
        obs_ref, act_ref = refs[0], refs[1]
        o_ref = refs[-1]
        p = refs[2:-1]

        # Layer 0: cat([obs, act]) @ W1 + b1  ==  obs @ W1_obs + act @ W1_act + b1
        h = (
            jnp.dot(obs_ref[...], p[0][...], preferred_element_type=jnp.float32)
            + jnp.dot(act_ref[...], p[1][...], preferred_element_type=jnp.float32)
            + p[2][...]
        )
        if n_layers > 1:
            h = act_fn(h)

        idx = 3
        for li in range(1, n_layers):
            w_ref, b_ref = p[idx], p[idx + 1]
            idx += 2
            hc = h.astype(w_ref.dtype)  # matmul operands in compute dtype, f32 accum
            h = jnp.dot(hc, w_ref[...], preferred_element_type=jnp.float32) + b_ref[...]
            if li < n_layers - 1:
                h = act_fn(h)

        o_ref[...] = h.astype(o_ref.dtype)

    return kernel


# ----------------------------------------------------------------------------- model
class MLPCriticPallas:
    """MLPCritic forward pass with a single fused Pallas TPU kernel."""

    def __init__(self, obs_dim, act_dim, hidden_sizes, activation="relu",
                 compute_dtype=jnp.float32, seed=42):
        self.obs_dim = int(obs_dim)
        self.act_dim = int(act_dim)
        self.activation = activation
        self.compute_dtype = compute_dtype

        sizes = [self.obs_dim + self.act_dim] + list(hidden_sizes) + [1]
        self.n_layers = len(sizes) - 1

        # Padded (lane-dense) feature dims.
        self.obs_pad = _round_up(self.obs_dim, LANE)
        self.act_pad = _round_up(self.act_dim, LANE)
        self.dims_pad = [_round_up(d, LANE) for d in sizes[1:]]  # per-layer output dims
        self.out_pad = self.dims_pad[-1]

        key = jax.random.PRNGKey(seed)

        def init_linear(k, fan_in, fan_out):
            # PyTorch nn.Linear default: U(-1/sqrt(fan_in), 1/sqrt(fan_in)) for W and b.
            kw, kb = jax.random.split(k)
            bound = 1.0 / jnp.sqrt(jnp.asarray(fan_in, jnp.float32))
            w = jax.random.uniform(kw, (fan_in, fan_out), jnp.float32, -bound, bound)
            b = jax.random.uniform(kb, (fan_out,), jnp.float32, -bound, bound)
            return w, b

        keys = jax.random.split(key, self.n_layers)

        # Pre-padded, pre-cast parameters. Zero padding keeps padded lanes exactly 0
        # through every layer (zero rows in the next W), so no masking is needed.
        self.params = []

        # Layer 0 split into obs / act halves (removes the torch.cat).
        w1, b1 = init_linear(keys[0], sizes[0], sizes[1])
        w1o = jnp.zeros((self.obs_pad, self.dims_pad[0]), compute_dtype)
        w1o = w1o.at[: self.obs_dim, : sizes[1]].set(w1[: self.obs_dim].astype(compute_dtype))
        w1a = jnp.zeros((self.act_pad, self.dims_pad[0]), compute_dtype)
        w1a = w1a.at[: self.act_dim, : sizes[1]].set(w1[self.obs_dim :].astype(compute_dtype))
        b1p = jnp.zeros((1, self.dims_pad[0]), jnp.float32).at[0, : sizes[1]].set(b1)
        self.params += [w1o, w1a, b1p]

        for li in range(1, self.n_layers):
            w, b = init_linear(keys[li], sizes[li], sizes[li + 1])
            wp = jnp.zeros((self.dims_pad[li - 1], self.dims_pad[li]), compute_dtype)
            wp = wp.at[: sizes[li], : sizes[li + 1]].set(w.astype(compute_dtype))
            bp = jnp.zeros((1, self.dims_pad[li]), jnp.float32).at[0, : sizes[li + 1]].set(b)
            self.params += [wp, bp]

        self._kernel = _build_fused_critic_kernel(self.n_layers, activation)
        self._forward = functools.partial(jax.jit(self._forward_impl))

    # ---------------------------------------------------------------- forward
    def _forward_impl(self, obs, act):
        M = obs.shape[0]

        # Row tiling: small batches -> one block; large batches -> 512-row blocks
        # (parallel axis -> shardable across v7x's 2 TensorCores, v7x-VMEM safe).
        M_pad = _round_up(M, SUBLANE)
        if M_pad > 512:
            block_m = 512
            M_pad = _round_up(M_pad, block_m)
        else:
            block_m = M_pad
        grid = (M_pad // block_m,)

        obs_p = jnp.pad(
            obs.astype(self.compute_dtype),
            ((0, M_pad - M), (0, self.obs_pad - self.obs_dim)),
        )
        act_p = jnp.pad(
            act.astype(self.compute_dtype),
            ((0, M_pad - M), (0, self.act_pad - self.act_dim)),
        )

        in_specs = [
            pl.BlockSpec((block_m, self.obs_pad), lambda i: (i, 0)),
            pl.BlockSpec((block_m, self.act_pad), lambda i: (i, 0)),
        ]
        for prm in self.params:
            in_specs.append(pl.BlockSpec(prm.shape, lambda i: (0, 0)))

        out = pl.pallas_call(
            self._kernel,
            out_shape=jax.ShapeDtypeStruct((M_pad, self.out_pad), jnp.float32),
            grid=grid,
            in_specs=in_specs,
            out_specs=pl.BlockSpec((block_m, self.out_pad), lambda i: (i, 0)),
            compiler_params=pltpu.CompilerParams(
                dimension_semantics=("parallel",),
            ),
        )(obs_p, act_p, *self.params)

        # Real output is column 0 of the padded lane block; squeeze(-1) semantics.
        return out[:M, 0]

    def __call__(self, obs, act):
        return self._forward(obs, act)

    # TODO(synk): MLPCritic.dataparallel (nn.DataParallel) has no kernel-level
    # equivalent; multi-device execution is handled by JAX sharding outside.


# ----------------------------------------------------------------------------- main
if __name__ == "__main__":
    batch = 2
    obs_dim = 16
    act_dim = 4
    hidden_sizes = [32, 32]

    critic = MLPCriticPallas(obs_dim, act_dim, hidden_sizes, activation="relu")

    key = jax.random.PRNGKey(0)
    k_obs, k_act = jax.random.split(key)
    obs = jax.random.normal(k_obs, (batch, obs_dim), dtype=jnp.float32)
    act = jax.random.normal(k_act, (batch, act_dim), dtype=jnp.float32)

    q = critic(obs, act)
    q = jax.block_until_ready(q)

    assert q.shape == (batch,), q.shape
    assert bool(jnp.all(jnp.isfinite(q)))
    print("KERNEL_OK")
</pallas_src>

<mosaic_0001>
module attributes {stable_mosaic.version = 11 : i64} {
  func.func @kernel(%arg0: i32, %arg1: memref<8x128xf32, #tpu.memory_space<vmem>>, %arg2: memref<8x128xf32, #tpu.memory_space<vmem>>, %arg3: memref<128x128xf32, #tpu.memory_space<vmem>>, %arg4: memref<128x128xf32, #tpu.memory_space<vmem>>, %arg5: memref<1x128xf32, #tpu.memory_space<vmem>>, %arg6: memref<128x128xf32, #tpu.memory_space<vmem>>, %arg7: memref<1x128xf32, #tpu.memory_space<vmem>>, %arg8: memref<128x128xf32, #tpu.memory_space<vmem>>, %arg9: memref<1x128xf32, #tpu.memory_space<vmem>>, %arg10: memref<8x128xf32, #tpu.memory_space<vmem>>) attributes {dimension_semantics = [#tpu.dimension_semantics<parallel>], iteration_bounds = array<i64: 1>, scalar_prefetch = 0 : i64, scratch_operands = 0 : i64, tpu.core_type = #tpu.core_type<tc>, window_params = [{transform_indices = @transform_0, window_bounds = array<i64: 8, 128>}, {transform_indices = @transform_1, window_bounds = array<i64: 8, 128>}, {pipeline_mode = #tpu.pipeline_mode<synchronous>, transform_indices = @transform_2, window_bounds = array<i64: 128, 128>}, {pipeline_mode = #tpu.pipeline_mode<synchronous>, transform_indices = @transform_3, window_bounds = array<i64: 128, 128>}, {pipeline_mode = #tpu.pipeline_mode<synchronous>, transform_indices = @transform_4, window_bounds = array<i64: 1, 128>}, {pipeline_mode = #tpu.pipeline_mode<synchronous>, transform_indices = @transform_5, window_bounds = array<i64: 128, 128>}, {pipeline_mode = #tpu.pipeline_mode<synchronous>, transform_indices = @transform_6, window_bounds = array<i64: 1, 128>}, {pipeline_mode = #tpu.pipeline_mode<synchronous>, transform_indices = @transform_7, window_bounds = array<i64: 128, 128>}, {pipeline_mode = #tpu.pipeline_mode<synchronous>, transform_indices = @transform_8, window_bounds = array<i64: 1, 128>}, {transform_indices = @transform_9, window_bounds = array<i64: 8, 128>}]} {
    %c0 = arith.constant 0 : index
    %c0_0 = arith.constant 0 : index
    %0 = vector.load %arg1[%c0, %c0_0] : memref<8x128xf32, #tpu.memory_space<vmem>>, vector<8x128xf32>
    %c0_1 = arith.constant 0 : index
    %c0_2 = arith.constant 0 : index
    %1 = vector.load %arg3[%c0_1, %c0_2] : memref<128x128xf32, #tpu.memory_space<vmem>>, vector<128x128xf32>
    %cst = arith.constant dense<0.000000e+00> : vector<8x128xf32>
    %2 = tpu.matmul %0, %1, %cst {dimension_numbers = #tpu.dot_dimension_numbers<[1], [0], [0], [1], [0, 0, 1, 1], [], []>} : vector<8x128xf32>, vector<128x128xf32>, vector<8x128xf32> -> vector<8x128xf32>
    %c0_3 = arith.constant 0 : index
    %c0_4 = arith.constant 0 : index
    %3 = vector.load %arg2[%c0_3, %c0_4] : memref<8x128xf32, #tpu.memory_space<vmem>>, vector<8x128xf32>
    %c0_5 = arith.constant 0 : index
    %c0_6 = arith.constant 0 : index
    %4 = vector.load %arg4[%c0_5, %c0_6] : memref<128x128xf32, #tpu.memory_space<vmem>>, vector<128x128xf32>
    %cst_7 = arith.constant dense<0.000000e+00> : vector<8x128xf32>
    %5 = tpu.matmul %3, %4, %cst_7 {dimension_numbers = #tpu.dot_dimension_numbers<[1], [0], [0], [1], [0, 0, 1, 1], [], []>} : vector<8x128xf32>, vector<128x128xf32>, vector<8x128xf32> -> vector<8x128xf32>
    %6 = arith.addf %2, %5 : vector<8x128xf32>
    %c0_8 = arith.constant 0 : index
    %c0_9 = arith.constant 0 : index
    %7 = vector.load %arg5[%c0_8, %c0_9] : memref<1x128xf32, #tpu.memory_space<vmem>>, vector<1x128xf32>
    %8 = vector.broadcast %7 : vector<1x128xf32> to vector<8x128xf32>
    %9 = arith.addf %6, %8 : vector<8x128xf32>
    %cst_10 = arith.constant 0.000000e+00 : f32
    %10 = vector.broadcast %cst_10 : f32 to vector<8x128xf32>
    %11 = arith.maximumf %9, %10 : vector<8x128xf32>
    %c0_11 = arith.constant 0 : index
    %c0_12 = arith.constant 0 : index
    %12 = vector.load %arg6[%c0_11, %c0_12] : memref<128x128xf32, #tpu.memory_space<vmem>>, vector<128x128xf32>
    %cst_13 = arith.constant dense<0.000000e+00> : vector<8x128xf32>
    %13 = tpu.matmul %11, %12, %cst_13 {dimension_numbers = #tpu.dot_dimension_numbers<[1], [0], [0], [1], [0, 0, 1, 1], [], []>} : vector<8x128xf32>, vector<128x128xf32>, vector<8x128xf32> -> vector<8x128xf32>
    %c0_14 = arith.constant 0 : index
    %c0_15 = arith.constant 0 : index
    %14 = vector.load %arg7[%c0_14, %c0_15] : memref<1x128xf32, #tpu.memory_space<vmem>>, vector<1x128xf32>
    %15 = vector.broadcast %14 : vector<1x128xf32> to vector<8x128xf32>
    %16 = arith.addf %13, %15 : vector<8x128xf32>
    %cst_16 = arith.constant 0.000000e+00 : f32
    %17 = vector.broadcast %cst_16 : f32 to vector<8x128xf32>
    %18 = arith.maximumf %16, %17 : vector<8x128xf32>
    %c0_17 = arith.constant 0 : index
    %c0_18 = arith.constant 0 : index
    %19 = vector.load %arg8[%c0_17, %c0_18] : memref<128x128xf32, #tpu.memory_space<vmem>>, vector<128x128xf32>
    %cst_19 = arith.constant dense<0.000000e+00> : vector<8x128xf32>
    %20 = tpu.matmul %18, %19, %cst_19 {dimension_numbers = #tpu.dot_dimension_numbers<[1], [0], [0], [1], [0, 0, 1, 1], [], []>} : vector<8x128xf32>, vector<128x128xf32>, vector<8x128xf32> -> vector<8x128xf32>
    %c0_20 = arith.constant 0 : index
    %c0_21 = arith.constant 0 : index
    %21 = vector.load %arg9[%c0_20, %c0_21] : memref<1x128xf32, #tpu.memory_space<vmem>>, vector<1x128xf32>
    %22 = vector.broadcast %21 : vector<1x128xf32> to vector<8x128xf32>
    %23 = arith.addf %20, %22 : vector<8x128xf32>
    %c0_22 = arith.constant 0 : index
    %c0_23 = arith.constant 0 : index
    %24 = vector.load %arg10[%c0_22, %c0_23] : memref<8x128xf32, #tpu.memory_space<vmem>>, vector<8x128xf32>
    tpu.vector_store %arg10[%c0_22, %c0_23], %23 {strides = array<i32>} : memref<8x128xf32, #tpu.memory_space<vmem>>, vector<8x128xf32>,
    return
  }
  func.func @transform_0(%arg0: i32) -> (i32, i32) {
    %c0_i32 = arith.constant 0 : i32
    %c0_i32_0 = arith.constant 0 : i32
    return %arg0, %c0_i32 : i32, i32
  }
  func.func @transform_1(%arg0: i32) -> (i32, i32) {
    %c0_i32 = arith.constant 0 : i32
    %c0_i32_0 = arith.constant 0 : i32
    return %arg0, %c0_i32 : i32, i32
  }
  func.func @transform_2(%arg0: i32) -> (i32, i32) {
    %c0_i32 = arith.constant 0 : i32
    %c0_i32_0 = arith.constant 0 : i32
    %c0_i32_1 = arith.constant 0 : i32
    return %c0_i32, %c0_i32_0 : i32, i32
  }
  func.func @transform_3(%arg0: i32) -> (i32, i32) {
    %c0_i32 = arith.constant 0 : i32
    %c0_i32_0 = arith.constant 0 : i32
    %c0_i32_1 = arith.constant 0 : i32
    return %c0_i32, %c0_i32_0 : i32, i32
  }
  func.func @transform_4(%arg0: i32) -> (i32, i32) {
    %c0_i32 = arith.constant 0 : i32
    %c0_i32_0 = arith.constant 0 : i32
    %c0_i32_1 = arith.constant 0 : i32
    return %c0_i32, %c0_i32_0 : i32, i32
  }
  func.func @transform_5(%arg0: i32) -> (i32, i32) {
    %c0_i32 = arith.constant 0 : i32
    %c0_i32_0 = arith.constant 0 : i32
    %c0_i32_1 = arith.constant 0 : i32
    return %c0_i32, %c0_i32_0 : i32, i32
  }
  func.func @transform_6(%arg0: i32) -> (i32, i32) {
    %c0_i32 = arith.constant 0 : i32
    %c0_i32_0 = arith.constant 0 : i32
    %c0_i32_1 = arith.constant 0 : i32
    return %c0_i32, %c0_i32_0 : i32, i32
  }
  func.func @transform_7(%arg0: i32) -> (i32, i32) {
    %c0_i32 = arith.constant 0 : i32
    %c0_i32_0 = arith.constant 0 : i32
    %c0_i32_1 = arith.constant 0 : i32
    return %c0_i32, %c0_i32_0 : i32, i32
  }
  func.func @transform_8(%arg0: i32) -> (i32, i32) {
    %c0_i32 = arith.constant 0 : i32
    %c0_i32_0 = arith.constant 0 : i32
    %c0_i32_1 = arith.constant 0 : i32
    return %c0_i32, %c0_i32_0 : i32, i32
  }
  func.func @transform_9(%arg0: i32) -> (i32, i32) {
    %c0_i32 = arith.constant 0 : i32
    %c0_i32_0 = arith.constant 0 : i32
    return %arg0, %c0_i32 : i32, i32
  }
}

</mosaic_0001>

<bundles_post_ra>
// kernel: _forward_impl.1
= control target key start
LH: loop header
LB: loop body
LE: loop exit
PB: predicated region body
PF: predicated region fallthrough
CT: control target
= control target key end

     0   :  { %14 = vsyncpa [#allocation3], 0  ;;  %s942_s0 = inlined_call_operand.vmem [shape: f32[8,128], index: 0, kind: input, shape index: {}]   ;;  %s943_s1 = inlined_call_operand.vmem [shape: f32[8,128], index: 1, kind: input, shape index: {}]   ;;  %s944_s2 = inlined_call_operand.hbm [shape: f32[128,128], index: 2, kind: input, shape index: {}]   ;;  %s945_s3 = inlined_call_operand.hbm [shape: f32[128,128], index: 3, kind: input, shape index: {}]   ;;  %s946_s4 = inlined_call_operand.vmem [shape: f32[1,128], index: 4, kind: input, shape index: {}]   ;;  %s947_s5 = inlined_call_operand.hbm [shape: f32[128,128], index: 5, kind: input, shape index: {}]   ;;  %s948_s6 = inlined_call_operand.vmem [shape: f32[1,128], index: 6, kind: input, shape index: {}]   ;;  %s949_s7 = inlined_call_operand.hbm [shape: f32[128,128], index: 7, kind: input, shape index: {}]   ;;  %s950_s8 = inlined_call_operand.vmem [shape: f32[1,128], index: 8, kind: input, shape index: {}]   ;;  %s951_s9 = inlined_call_operand.vmem [shape: f32[8,128], index: 9, kind: output, shape index: {}]  }
   0x1   :  { %15 = vsyncpa [#allocation5], 0 }
   0x2   :  { %16 = vsyncpa [#allocation8], 0  ;;  %s770_s30 = smov [#allocation4]   ;;  %s771_s11 = smov [#allocation2]  }
   0x3   :  { %s38_s10 = sshll.u32 %s770_s30, 4  ;;  %s26_s12 = sshll.u32 %s771_s11, 4  ;;  %s39_s10 = int_to_ptr.vmem [resolvable:$true] %s38_s10  ;;  %s27_s12 = int_to_ptr.vmem [resolvable:$true] %s26_s12 }
   0x4   :  { %s692_s13 = scalar_lea.vmem %s39_s10, 2048  ;;  %p697_p1 = scmp.lt.s32.totalorder %s39_s10, %s39_s10 }
   0x5   :  { %p693_p0 = scmp.ne.s32.totalorder %s39_s10, %s692_s13  ;;  %p698_p2 = scmp.lt.s32.totalorder %s692_s13, %s692_s13 }
   0x7   :  { %p699_p3 = por %p698_p2, %p697_p1 }
   0x9   :  { %p700_p4 = pnand %p699_p3, %p693_p0 }
   0xb   :  { %703 = shalt.err (!%p700_p4)
}
   0xc   :  { %s772_s14 = smov 128   ;;  %s773_s15 = smov 8  }
   0xd   :  { %44 = dma.hbm_to_vmem [thread:$0]  %s945_s3, 2048, %s39_s10, [#allocation5], %s772_s14, %s772_s14, %s773_s15  }
   0xe   :  { %s712_s18 = scalar_lea.vmem %s27_s12, 2048  ;;  %p717_p6 = scmp.lt.s32.totalorder %s27_s12, %s27_s12 }
   0xf   :  { %p713_p5 = scmp.ne.s32.totalorder %s27_s12, %s712_s18  ;;  %p718_p7 = scmp.lt.s32.totalorder %s712_s18, %s712_s18 }
  0x11   :  { %p719_p8 = por %p718_p7, %p717_p6 }
  0x13   :  { %p720_p9 = pnand %p719_p8, %p713_p5 }
  0x15   :  { %723 = shalt.err (!%p720_p9)
}
  0x16   :  { %32 = dma.hbm_to_vmem [thread:$0]  %s944_s2, 2048, %s27_s12, [#allocation3], %s772_s14, %s772_s14, %s773_s15  }
  0x17   :  { %s774_s21 = smov [#allocation6]   ;;  %s775_s23 = smov [#allocation7]  }
  0x18   :  { %s52_s22 = sshll.u32 %s774_s21, 4  ;;  %s66_s24 = sshll.u32 %s775_s23, 4  ;;  %s53_s22 = int_to_ptr.vmem [resolvable:$true] %s52_s22  ;;  %s67_s24 = int_to_ptr.vmem [resolvable:$true] %s66_s24 }
  0x19   :  { %s732_s3 = scalar_lea.vmem %s53_s22, 2048  ;;  %p737_p11 = scmp.lt.s32.totalorder %s53_s22, %s53_s22 }
  0x1a   :  { %p733_p10 = scmp.ne.s32.totalorder %s53_s22, %s732_s3  ;;  %p738_p12 = scmp.lt.s32.totalorder %s732_s3, %s732_s3 }
  0x1c   :  { %p739_p13 = por %p738_p12, %p737_p11 }
  0x1e   :  { %p740_p0 = pnand %p739_p13, %p733_p10 }
  0x20   :  { %743 = shalt.err (!%p740_p0)
}
  0x21   :  { %58 = dma.hbm_to_vmem [thread:$0]  %s947_s5, 2048, %s53_s22, [#allocation5], %s772_s14, %s772_s14, %s773_s15  }
  0x22   :  { %s752_s2 = scalar_lea.vmem %s67_s24, 2048  ;;  %p757_p2 = scmp.lt.s32.totalorder %s67_s24, %s67_s24 }
  0x23   :  { %p753_p1 = scmp.ne.s32.totalorder %s67_s24, %s752_s2  ;;  %p758_p3 = scmp.lt.s32.totalorder %s752_s2, %s752_s2 }
  0x25   :  { %p759_p4 = por %p758_p3, %p757_p2 }
  0x27   :  { %p760_p5 = pnand %p759_p4, %p753_p1 }
  0x29   :  { %763 = shalt.err (!%p760_p5)
}
  0x2a   :  { %72 = dma.hbm_to_vmem [thread:$0]  %s949_s7, 2048, %s67_s24, [#allocation8], %s772_s14, %s772_s14, %s773_s15  }
  0x2b   :  { %764 = dma.done.wait [#allocation3], 2048  }
  0x2c   :  { %765 = vsyncadd [#allocation3], 4294965248 }
  0x2d   :  { %766 = dma.done.wait [#allocation5], 4096  }
  0x2e   :  { %767 = vsyncadd [#allocation5], 4294963200 }
  0x2f   :  { %768 = dma.done.wait [#allocation8], 2048  }
  0x30   :  { %769 = vsyncadd [#allocation8], 4294965248  ;;  %v776_v0 = vmov 0.0   ;;  %vm777_vm0 = vmmov 0   ;;  %v120_v1 = vld [vmem:[#allocation4 + $0x78] sm:$0xff]  ;;  %v119_v3 = vld [vmem:[#allocation4 + $0x70] sm:$0xff] }
  0x31   :  { %536 = vmatprep.subr.mxu0 %v776_v0  ;;  %571 = vmatprep.subr.mxu1 %v776_v0  ;;  %v103_v2 = vld [vmem:[#allocation2 + $0x78] sm:$0xff]  ;;  %v102_v4 = vld [vmem:[#allocation2 + $0x70] sm:$0xff]  ;;  %v118_v5 = vld [vmem:[#allocation4 + $0x68] sm:$0xff] }
  0x32   :  { %568 = vmatprep.mubr.msk.f32.mxu0 %vm777_vm0, %v776_v0  ;;  %603 = vmatprep.mubr.msk.f32.mxu1 %vm777_vm0, %v776_v0  ;;  %v101_v6 = vld [vmem:[#allocation2 + $0x68] sm:$0xff]  ;;  %v117_v7 = vld [vmem:[#allocation4 + $0x60] sm:$0xff]  ;;  %v116_v9 = vld [vmem:[#allocation4 + $0x58] sm:$0xff] }
  0x33   :  { %537 = vmatpush3.msra.mxu0 %v120_v1  ;;  %572 = vmatpush3.msra.mxu1 %v103_v2  ;;  %v100_v8 = vld [vmem:[#allocation2 + $0x60] sm:$0xff]  ;;  %v99_v10 = vld [vmem:[#allocation2 + $0x58] sm:$0xff]  ;;  %v115_v11 = vld [vmem:[#allocation4 + $0x50] sm:$0xff] }
  0x34   :  { %538 = vmatprep.subr.mxu0 %v776_v0  ;;  %573 = vmatprep.subr.mxu1 %v776_v0  ;;  %v98_v12 = vld [vmem:[#allocation2 + $0x50] sm:$0xff]  ;;  %v114_v13 = vld [vmem:[#allocation4 + $0x48] sm:$0xff]  ;;  %v113_v15 = vld [vmem:[#allocation4 + $0x40] sm:$0xff] }
  0x35   :  { %539 = vmatpush3.msra.mxu0 %v119_v3  ;;  %574 = vmatpush3.msra.mxu1 %v102_v4  ;;  %v97_v14 = vld [vmem:[#allocation2 + $0x48] sm:$0xff]  ;;  %v96_v16 = vld [vmem:[#allocation2 + $0x40] sm:$0xff]  ;;  %v112_v17 = vld [vmem:[#allocation4 + $0x38] sm:$0xff] }
  0x36   :  { %540 = vmatprep.subr.mxu0 %v776_v0  ;;  %575 = vmatprep.subr.mxu1 %v776_v0  ;;  %v95_v18 = vld [vmem:[#allocation2 + $0x38] sm:$0xff]  ;;  %v111_v19 = vld [vmem:[#allocation4 + $0x30] sm:$0xff]  ;;  %v110_v21 = vld [vmem:[#allocation4 + $0x28] sm:$0xff] }
  0x37   :  { %541 = vmatpush3.msra.mxu0 %v118_v5  ;;  %576 = vmatpush3.msra.mxu1 %v101_v6  ;;  %v94_v20 = vld [vmem:[#allocation2 + $0x30] sm:$0xff]  ;;  %v93_v22 = vld [vmem:[#allocation2 + $0x28] sm:$0xff]  ;;  %v109_v23 = vld [vmem:[#allocation4 + $0x20] sm:$0xff] }
  0x38   :  { %542 = vmatprep.subr.mxu0 %v776_v0  ;;  %577 = vmatprep.subr.mxu1 %v776_v0  ;;  %v92_v24 = vld [vmem:[#allocation2 + $0x20] sm:$0xff]  ;;  %v108_v25 = vld [vmem:[#allocation4 + $0x18] sm:$0xff]  ;;  %v107_v27 = vld [vmem:[#allocation4 + $0x10] sm:$0xff] }
  0x39   :  { %543 = vmatpush3.msra.mxu0 %v117_v7  ;;  %578 = vmatpush3.msra.mxu1 %v100_v8  ;;  %v91_v26 = vld [vmem:[#allocation2 + $0x18] sm:$0xff]  ;;  %v90_v28 = vld [vmem:[#allocation2 + $0x10] sm:$0xff]  ;;  %v106_v29 = vld [vmem:[#allocation4 + $0x8] sm:$0xff] }
  0x3a   :  { %544 = vmatprep.subr.mxu0 %v776_v0  ;;  %579 = vmatprep.subr.mxu1 %v776_v0  ;;  %v89_v30 = vld [vmem:[#allocation2 + $0x8] sm:$0xff]  ;;  %v105_v31 = vld [vmem:[#allocation4] sm:$0xff]  ;;  %v285_v35 = vld [vmem:[#allocation6 + $0x78] sm:$0xff] }
  0x3b   :  { %545 = vmatpush3.msra.mxu0 %v116_v9  ;;  %580 = vmatpush3.msra.mxu1 %v99_v10  ;;  %v88_v32 = vld [vmem:[#allocation2] sm:$0xff]  ;;  %v284_v36 = vld [vmem:[#allocation6 + $0x70] sm:$0xff]  ;;  %v283_v37 = vld [vmem:[#allocation6 + $0x68] sm:$0xff] }
  0x3c   :  { %546 = vmatprep.subr.mxu0 %v776_v0  ;;  %581 = vmatprep.subr.mxu1 %v776_v0  ;;  %v104_v33 = vld [vmem:[%s943_s1] sm:$0xff]  ;;  %v281_v39 = vld [vmem:[#allocation6 + $0x58] sm:$0xff]  ;;  %v280_v40 = vld [vmem:[#allocation6 + $0x50] sm:$0xff] }
  0x3d   :  { %547 = vmatpush3.msra.mxu0 %v115_v11  ;;  %582 = vmatpush3.msra.mxu1 %v98_v12  ;;  %v87_v34 = vld [vmem:[%s942_s0] sm:$0xff]  ;;  %v279_v41 = vld [vmem:[#allocation6 + $0x48] sm:$0xff]  ;;  %v277_v43 = vld [vmem:[#allocation6 + $0x38] sm:$0xff] }
  0x3e   :  { %548 = vmatprep.subr.mxu0 %v776_v0  ;;  %583 = vmatprep.subr.mxu1 %v776_v0  ;;  %v282_v38 = vld [vmem:[#allocation6 + $0x60] sm:$0xff]  ;;  %v276_v44 = vld [vmem:[#allocation6 + $0x30] sm:$0xff]  ;;  %v275_v45 = vld [vmem:[#allocation6 + $0x28] sm:$0xff] }
  0x3f   :  { %549 = vmatpush3.msra.mxu0 %v114_v13  ;;  %584 = vmatpush3.msra.mxu1 %v97_v14  ;;  %v278_v42 = vld [vmem:[#allocation6 + $0x40] sm:$0xff]  ;;  %v273_v47 = vld [vmem:[#allocation6 + $0x18] sm:$0xff]  ;;  %v272_v48 = vld [vmem:[#allocation6 + $0x10] sm:$0xff] }
  0x40   :  { %550 = vmatprep.subr.mxu0 %v776_v0  ;;  %585 = vmatprep.subr.mxu1 %v776_v0  ;;  %v274_v46 = vld [vmem:[#allocation6 + $0x20] sm:$0xff]  ;;  %v271_v49 = vld [vmem:[#allocation6 + $0x8] sm:$0xff]  ;;  %v379_v51 = vld [vmem:[#allocation7 + $0x78] sm:$0xff] }
  0x41   :  { %551 = vmatpush3.msra.mxu0 %v113_v15  ;;  %586 = vmatpush3.msra.mxu1 %v96_v16  ;;  %v270_v50 = vld [vmem:[#allocation6] sm:$0xff]  ;;  %v378_v52 = vld [vmem:[#allocation7 + $0x70] sm:$0xff]  ;;  %v377_v53 = vld [vmem:[#allocation7 + $0x68] sm:$0xff] }
  0x42   :  { %552 = vmatprep.subr.mxu0 %v776_v0  ;;  %587 = vmatprep.subr.mxu1 %v776_v0  ;;  %v376_v54 = vld [vmem:[#allocation7 + $0x60] sm:$0xff]  ;;  %v375_v55 = vld [vmem:[#allocation7 + $0x58] sm:$0xff]  ;;  %v374_v56 = vld [vmem:[#allocation7 + $0x50] sm:$0xff] }
  0x43   :  { %553 = vmatpush3.msra.mxu0 %v112_v17  ;;  %588 = vmatpush3.msra.mxu1 %v95_v18  ;;  %v373_v57 = vld [vmem:[#allocation7 + $0x48] sm:$0xff]  ;;  %v372_v58 = vld [vmem:[#allocation7 + $0x40] sm:$0xff]  ;;  %v371_v59 = vld [vmem:[#allocation7 + $0x38] sm:$0xff] }
  0x44   :  { %554 = vmatprep.subr.mxu0 %v776_v0  ;;  %589 = vmatprep.subr.mxu1 %v776_v0  ;;  %v370_v60 = vld [vmem:[#allocation7 + $0x30] sm:$0xff]  ;;  %v369_v61 = vld [vmem:[#allocation7 + $0x28] sm:$0xff]  ;;  %v368_v62 = vld [vmem:[#allocation7 + $0x20] sm:$0xff] }
  0x45   :  { %555 = vmatpush3.msra.mxu0 %v111_v19  ;;  %590 = vmatpush3.msra.mxu1 %v94_v20  ;;  %v367_v63 = vld [vmem:[#allocation7 + $0x18] sm:$0xff]  ;;  %v465_v3 = vld [vmem:[%s946_s4] ss:$0 sm:$0xff]  ;;  %v366_v9 = vld [vmem:[#allocation7 + $0x10] sm:$0xff] }
  0x46   :  { %556 = vmatprep.subr.mxu0 %v776_v0  ;;  %591 = vmatprep.subr.mxu1 %v776_v0  ;;  %v365_v10 = vld [vmem:[#allocation7 + $0x8] sm:$0xff]  ;;  %v364_v11 = vld [vmem:[#allocation7] sm:$0xff] }
  0x47   :  { %557 = vmatpush3.msra.mxu0 %v110_v21  ;;  %592 = vmatpush3.msra.mxu1 %v93_v22  ;;  %v466_v12 = vld [vmem:[%s948_s6] ss:$0 sm:$0xff] }
  0x48   :  { %558 = vmatprep.subr.mxu0 %v776_v0  ;;  %593 = vmatprep.subr.mxu1 %v776_v0  ;;  %v467_v17 = vld [vmem:[%s950_s8] ss:$0 sm:$0xff] }
  0x49   :  { %559 = vmatpush3.msra.mxu0 %v109_v23  ;;  %594 = vmatpush3.msra.mxu1 %v92_v24 }
  0x4a   :  { %560 = vmatprep.subr.mxu0 %v776_v0  ;;  %595 = vmatprep.subr.mxu1 %v776_v0 }
  0x4b   :  { %561 = vmatpush3.msra.mxu0 %v108_v25  ;;  %596 = vmatpush3.msra.mxu1 %v91_v26 }
  0x4c   :  { %562 = vmatprep.subr.mxu0 %v776_v0  ;;  %597 = vmatprep.subr.mxu1 %v776_v0 }
  0x4d   :  { %563 = vmatpush3.msra.mxu0 %v107_v27  ;;  %598 = vmatpush3.msra.mxu1 %v90_v28 }
  0x4e   :  { %564 = vmatprep.subr.mxu0 %v776_v0  ;;  %599 = vmatprep.subr.mxu1 %v776_v0 }
  0x4f   :  { %565 = vmatpush3.msra.mxu0 %v106_v29  ;;  %600 = vmatpush3.msra.mxu1 %v89_v30 }
  0x50   :  { %566 = vmatprep.subr.mxu0 %v776_v0  ;;  %601 = vmatprep.subr.mxu1 %v776_v0 }
  0x51   :  { %567 = vmatpush3.msra.mxu0 %v105_v31  ;;  %602 = vmatpush3.msra.mxu1 %v88_v32 }
  0x52   :  { %569 = vmatmul.mubr.f32.vlgmr.msra.gmra.mxu0 %v104_v33  ;;  %604 = vmatmul.mubr.f32.vlgmr.msra.gmra.mxu1 %v87_v34 }
  0x53   :  { %606 = vmatprep.subr.mxu0 %v776_v0  ;;  %638 = vmatprep.mubr.msk.f32.mxu0 %vm777_vm0, %v776_v0 }
  0x54   :  { %607 = vmatpush3.msra.mxu0 %v285_v35  ;;  %641 = vmatprep.subr.mxu1 %v776_v0 }
  0x55   :  { %608 = vmatprep.subr.mxu0 %v776_v0  ;;  %673 = vmatprep.mubr.msk.f32.mxu1 %vm777_vm0, %v776_v0 }
  0x56   :  { %609 = vmatpush3.msra.mxu0 %v284_v36  ;;  %642 = vmatpush3.msra.mxu1 %v379_v51 }
  0x57   :  { %610 = vmatprep.subr.mxu0 %v776_v0  ;;  %643 = vmatprep.subr.mxu1 %v776_v0 }
  0x58   :  { %611 = vmatpush3.msra.mxu0 %v283_v37  ;;  %644 = vmatpush3.msra.mxu1 %v378_v52 }
  0x59   :  { %612 = vmatprep.subr.mxu0 %v776_v0  ;;  %645 = vmatprep.subr.mxu1 %v776_v0 }
  0x5a   :  { %613 = vmatpush3.msra.mxu0 %v282_v38  ;;  %646 = vmatpush3.msra.mxu1 %v377_v53 }
  0x5b   :  { %614 = vmatprep.subr.mxu0 %v776_v0  ;;  %647 = vmatprep.subr.mxu1 %v776_v0 }
  0x5c   :  { %615 = vmatpush3.msra.mxu0 %v281_v39  ;;  %648 = vmatpush3.msra.mxu1 %v376_v54 }
  0x5d   :  { %616 = vmatprep.subr.mxu0 %v776_v0  ;;  %649 = vmatprep.subr.mxu1 %v776_v0 }
  0x5e   :  { %617 = vmatpush3.msra.mxu0 %v280_v40  ;;  %650 = vmatpush3.msra.mxu1 %v375_v55 }
  0x5f   :  { %618 = vmatprep.subr.mxu0 %v776_v0  ;;  %651 = vmatprep.subr.mxu1 %v776_v0 }
  0x60   :  { %619 = vmatpush3.msra.mxu0 %v279_v41  ;;  %652 = vmatpush3.msra.mxu1 %v374_v56 }
  0x61   :  { %620 = vmatprep.subr.mxu0 %v776_v0  ;;  %653 = vmatprep.subr.mxu1 %v776_v0 }
  0x62   :  { %621 = vmatpush3.msra.mxu0 %v278_v42  ;;  %654 = vmatpush3.msra.mxu1 %v373_v57 }
  0x63   :  { %622 = vmatprep.subr.mxu0 %v776_v0  ;;  %655 = vmatprep.subr.mxu1 %v776_v0 }
  0x64   :  { %623 = vmatpush3.msra.mxu0 %v277_v43  ;;  %656 = vmatpush3.msra.mxu1 %v372_v58 }
  0x65   :  { %624 = vmatprep.subr.mxu0 %v776_v0  ;;  %657 = vmatprep.subr.mxu1 %v776_v0 }
  0x66   :  { %625 = vmatpush3.msra.mxu0 %v276_v44  ;;  %658 = vmatpush3.msra.mxu1 %v371_v59 }
  0x67   :  { %626 = vmatprep.subr.mxu0 %v776_v0  ;;  %659 = vmatprep.subr.mxu1 %v776_v0 }
  0x68   :  { %627 = vmatpush3.msra.mxu0 %v275_v45  ;;  %660 = vmatpush3.msra.mxu1 %v370_v60 }
  0x69   :  { %628 = vmatprep.subr.mxu0 %v776_v0  ;;  %661 = vmatprep.subr.mxu1 %v776_v0 }
  0x6a   :  { %629 = vmatpush3.msra.mxu0 %v274_v46  ;;  %662 = vmatpush3.msra.mxu1 %v369_v61 }
  0x6b   :  { %630 = vmatprep.subr.mxu0 %v776_v0  ;;  %663 = vmatprep.subr.mxu1 %v776_v0 }
  0x6c   :  { %631 = vmatpush3.msra.mxu0 %v273_v47  ;;  %664 = vmatpush3.msra.mxu1 %v368_v62 }
  0x6d   :  { %632 = vmatprep.subr.mxu0 %v776_v0  ;;  %665 = vmatprep.subr.mxu1 %v776_v0 }
  0x6e   :  { %633 = vmatpush3.msra.mxu0 %v272_v48  ;;  %666 = vmatpush3.msra.mxu1 %v367_v63 }
  0x6f   :  { %634 = vmatprep.subr.mxu0 %v776_v0  ;;  %667 = vmatprep.subr.mxu1 %v776_v0 }
  0x70   :  { %635 = vmatpush3.msra.mxu0 %v271_v49  ;;  %668 = vmatpush3.msra.mxu1 %v366_v9 }
  0x71   :  { %636 = vmatprep.subr.mxu0 %v776_v0  ;;  %669 = vmatprep.subr.mxu1 %v776_v0 }
  0x72   :  { %637 = vmatpush3.msra.mxu0 %v270_v50  ;;  %670 = vmatpush3.msra.mxu1 %v365_v10 }
  0x73   :  { %671 = vmatprep.subr.mxu1 %v776_v0 }
  0x74   :  { %672 = vmatpush3.msra.mxu1 %v364_v11 }
 0x112   :  { %v187_v1 = vpop.f32.mrf.mxu0  ;;  %v257_v2 = vpop.f32.mrf.mxu1 }
 0x113   :  { %v258_v4 = vadd.f32 %v257_v2, %v187_v1 }
 0x114   :  { %v570_v5 = vpop.f32.mrf.mxu0  ;;  %v605_v6 = vpop.f32.mrf.mxu1 }
 0x115   :  { %v268_v7 = vadd.f32 %v465_v3, %v258_v4 }
 0x117   :  { %v269_v8 = vmax.f32 %v268_v7, 0.0 }
 0x119   :  { %639 = vmatmul.mubr.f32.vlgmr.msra.gmra.mxu0 %v269_v8 }
 0x1d9   :  { %v359_v13 = vpop.f32.mrf.mxu0 }
 0x1da   :  { %v360_v14 = vadd.f32 %v466_v12, %v359_v13 }
 0x1db   :  { %v640_v15 = vpop.f32.mrf.mxu0 }
 0x1dc   :  { %v363_v16 = vmax.f32 %v360_v14, 0.0 }
 0x1de   :  { %674 = vmatmul.mubr.f32.vlgmr.msra.gmra.mxu1 %v363_v16 }
 0x29e   :  { %v453_v18 = vpop.f32.mrf.mxu1 }
 0x29f   :  { %v454_v19 = vadd.f32 %v467_v17, %v453_v18 }
 0x2a0   :  { %v675_v20 = vpop.f32.mrf.mxu1 }
 0x2a1   :  { %457 = vst [vmem:[%s951_s9] sm:$0xff] %v454_v19 }
 0x2a2   :  { %462 = vsyncpa [#allocation3], 1 }
 0x2a3   :  { %463 = vsyncpa [#allocation5], 1 }
 0x2a4   :  { %464 = vsyncpa [#allocation8], 1 }

</bundles_post_ra>
